<compile_context>
chip_gen: v7x
topology: tpu7x:2x2x1
jax: 0.10.0
libtpu: 0.0.40
codegen_flags: <defaults>
</compile_context>

<pallas_src>
import functools

import jax
import jax.numpy as jnp
from jax.experimental import pallas as pl
from jax.experimental.pallas import tpu as pltpu


# ----------------------------- kernel -----------------------------------

def dae_kernel(
    x_ref, m_ref,
    ew1a_ref, ew1b_ref, eb1_ref,
    ew2_ref, eb2_ref,
    ew3_ref, eb3_ref,
    dw1_ref, db1_ref,
    dw2_ref, db2_ref,
    dw3_ref, db3_ref,
    mw1_ref, mb1_ref,
    mw2_ref, mb2_ref,
    bin_ref, pos_ref,
    cons_ref, p_ref,
):
    f32 = jnp.float32
    m = m_ref[...]
    x = x_ref[...] * m                      # x = x * mask

    # ---- encoder ----
    # concat([x, mask], 1) @ W1  ==  x @ W1[:D] + mask @ W1[D:]
    h = (jnp.dot(x, ew1a_ref[...], preferred_element_type=f32)
         + jnp.dot(m, ew1b_ref[...], preferred_element_type=f32)
         + eb1_ref[...])
    h = jnp.maximum(h, 0.0)
    h = jnp.maximum(
        jnp.dot(h, ew2_ref[...], preferred_element_type=f32) + eb2_ref[...], 0.0)
    latent = jnp.maximum(
        jnp.dot(h, ew3_ref[...], preferred_element_type=f32) + eb3_ref[...], 0.0)

    # ---- decoder ----
    d = jnp.maximum(
        jnp.dot(latent, dw1_ref[...], preferred_element_type=f32) + db1_ref[...], 0.0)
    d = jnp.maximum(
        jnp.dot(d, dw2_ref[...], preferred_element_type=f32) + db2_ref[...], 0.0)
    c = jnp.dot(d, dw3_ref[...], preferred_element_type=f32) + db3_ref[...]

    # ---- per-column type heads (shared exp: one EUP exp per element) ----
    t = jnp.exp(-jnp.abs(c))                # exp(-|c|), never overflows
    inv = 1.0 / (1.0 + t)
    sig = jnp.where(c >= 0.0, inv, t * inv)           # stable sigmoid(c)
    sp = jnp.maximum(c, 0.0) + jnp.log1p(t)           # stable softplus(c)
    bm = bin_ref[...]                        # (1, Dp) broadcast over batch
    pm = pos_ref[...]
    cons_ref[...] = jnp.where(bm > 0.5, sig, jnp.where(pm > 0.5, sp, c))

    # ---- mlp head (lane-dense padded to 128 output cols; col 0 is p) ----
    h2 = jnp.maximum(
        jnp.dot(latent, mw1_ref[...], preferred_element_type=f32) + mb1_ref[...], 0.0)
    logits = jnp.dot(h2, mw2_ref[...], preferred_element_type=f32) + mb2_ref[...]
    t2 = jnp.exp(-jnp.abs(logits))
    inv2 = 1.0 / (1.0 + t2)
    p_ref[...] = jnp.where(logits >= 0.0, inv2, t2 * inv2)


# ----------------------------- wrapper -----------------------------------

def _round_up(n, m):
    return (n + m - 1) // m * m


def _pad2(a, rows, cols):
    r, c = a.shape
    return jnp.pad(a, ((0, rows - r), (0, cols - c)))


@functools.partial(jax.jit, static_argnames=("block_b",))
def dae_forward(x, mask, params, bin_mask, pos_mask, *, block_b=256):
    (ew1, eb1, ew2, eb2, ew3, eb3,
     dw1, db1, dw2, db2, dw3, db3,
     mw1, mb1, mw2, mb2) = params

    B, D = x.shape
    E0 = ew1.shape[1]                 # 128
    E1 = ew2.shape[1]                 # 64
    L = ew3.shape[1]                  # latent_dim
    D1 = dw1.shape[1]                 # 64
    D2 = dw2.shape[1]                 # 128
    H = mw1.shape[1]                  # 100

    # Padded (lane-dense / aligned) sizes.  All pads are zero -> math identical.
    Dp = _round_up(max(D, 128), 128)
    Lp = _round_up(L, 8)
    Hp = _round_up(max(H, 128), 128)
    Pp = 128                          # p head written lane-dense, col 0 is p

    # Batch tiling: TB multiple of 8, capped at block_b; pad B up to the grid.
    TB = min(block_b, _round_up(B, 8))
    Bp = _round_up(B, TB)
    grid = (Bp // TB,)

    # ---- pad activations / masks ----
    xp = _pad2(x.astype(jnp.float32), Bp, Dp)
    mp = _pad2(mask.astype(jnp.float32), Bp, Dp)
    binp = _pad2(bin_mask.astype(jnp.float32), 1, Dp)
    posp = _pad2(pos_mask.astype(jnp.float32), 1, Dp)

    # ---- pad weights (zero rows/cols; concat weight split into two halves) ----
    ew1a = _pad2(ew1[:D], Dp, E0)
    ew1b = _pad2(ew1[D:], Dp, E0)
    eb1p = eb1
    ew2p, eb2p = ew2, eb2
    ew3p = _pad2(ew3, E1, Lp)
    eb3p = _pad2(eb3, 1, Lp)
    dw1p = _pad2(dw1, Lp, D1)
    db1p = db1
    dw2p, db2p = dw2, db2
    dw3p = _pad2(dw3, D2, Dp)
    db3p = _pad2(db3, 1, Dp)
    mw1p = _pad2(mw1, Lp, Hp)
    mb1p = _pad2(mb1, 1, Hp)
    mw2p = _pad2(mw2, Hp, Pp)
    mb2p = _pad2(mb2, 1, Pp)

    weights = (ew1a, ew1b, eb1p, ew2p, eb2p, ew3p, eb3p,
               dw1p, db1p, dw2p, db2p, dw3p, db3p,
               mw1p, mb1p, mw2p, mb2p, binp, posp)

    # ---- BlockSpecs: activation tiles sweep the grid, weights stay resident ----
    act_spec = pl.BlockSpec((TB, Dp), lambda i: (i, 0))

    def _resident(a):
        return pl.BlockSpec(a.shape, lambda i: (0, 0))

    in_specs = [act_spec, act_spec] + [_resident(w) for w in weights]
    out_specs = (pl.BlockSpec((TB, Dp), lambda i: (i, 0)),
                 pl.BlockSpec((TB, Pp), lambda i: (i, 0)))
    out_shapes = (jax.ShapeDtypeStruct((Bp, Dp), jnp.float32),   # constructed
                  jax.ShapeDtypeStruct((Bp, Pp), jnp.float32))   # p (padded lanes)

    # ---- VMEM budget: double-buffered activation tiles + resident weights ----
    weight_bytes = 4 * sum(int(w.size) for w in weights)
    act_tile_bytes = 4 * TB * (2 * Dp + Dp + Pp)        # x, mask, cons, p tiles
    vmem_need = 2 * (act_tile_bytes + weight_bytes)     # double-buffer headroom
    vmem_limit = min(64 * 1024 * 1024,
                     max(32 * 1024 * 1024, 2 * vmem_need))

    # ---- cost hint for XLA scheduling ----
    flops = 2 * Bp * (2 * Dp * E0 + E0 * E1 + E1 * Lp
                      + Lp * D1 + D1 * D2 + D2 * Dp
                      + Lp * Hp + Hp * Pp)
    transcendentals = Bp * (2 * Dp + Pp)          # exp + log1p per col, exp for p
    bytes_accessed = 4 * (2 * Bp * Dp + Bp * Dp + Bp * Pp) + weight_bytes
    cost = pl.CostEstimate(flops=flops, transcendentals=transcendentals,
                           bytes_accessed=bytes_accessed)

    cons_p, p_p = pl.pallas_call(
        dae_kernel,
        out_shape=out_shapes,
        grid_spec=pltpu.PrefetchScalarGridSpec(
            num_scalar_prefetch=0,
            grid=grid,
            in_specs=in_specs,
            out_specs=out_specs,
        ),
        compiler_params=pltpu.CompilerParams(
            dimension_semantics=("parallel",),
            vmem_limit_bytes=vmem_limit,
        ),
        cost_estimate=cost,
    )(xp, mp, *weights)

    # slice the padding away (wrapper-side layout plumbing only)
    return cons_p[:B, :D], p_p[:B, :1]


# ----------------------------- params / reference ------------------------

def init_linear(key, fan_in, fan_out):
    """PyTorch-style default Linear init, stored as (in, out) for x @ W."""
    k = 1.0 / jnp.sqrt(jnp.float32(fan_in))
    kw, kb = jax.random.split(key)
    w = jax.random.uniform(kw, (fan_in, fan_out), jnp.float32, -k, k)
    b = jax.random.uniform(kb, (1, fan_out), jnp.float32, -k, k)
    return w, b


def build_params(key, input_size, latent_dim, enc_units=(128, 64),
                 dec_units=(64, 128), mlp_hidden=100):
    keys = jax.random.split(key, 8)
    D, L = input_size, latent_dim
    ew1, eb1 = init_linear(keys[0], 2 * D, enc_units[0])
    ew2, eb2 = init_linear(keys[1], enc_units[0], enc_units[1])
    ew3, eb3 = init_linear(keys[2], enc_units[1], L)
    dw1, db1 = init_linear(keys[3], L, dec_units[0])
    dw2, db2 = init_linear(keys[4], dec_units[0], dec_units[1])
    dw3, db3 = init_linear(keys[5], dec_units[1], D)
    mw1, mb1 = init_linear(keys[6], L, mlp_hidden)
    mw2, mb2 = init_linear(keys[7], mlp_hidden, 1)
    return (ew1, eb1, ew2, eb2, ew3, eb3,
            dw1, db1, dw2, db2, dw3, db3,
            mw1, mb1, mw2, mb2)


def build_type_masks(types_list, input_size):
    bin_mask = jnp.zeros((1, input_size), jnp.float32)
    pos_mask = jnp.zeros((1, input_size), jnp.float32)
    for kind, idx in types_list:
        idx = jnp.asarray(idx, jnp.int32)
        if kind == "binary":
            bin_mask = bin_mask.at[0, idx].set(1.0)
        elif kind == "real_positive":
            pos_mask = pos_mask.at[0, idx].set(1.0)
        # other types ('real', 'count', ...) pass through unchanged
    return bin_mask, pos_mask


def reference_forward(x, mask, params, bin_mask, pos_mask):
    """Pure-JAX reference of the same forward pass (for sanity checking)."""
    (ew1, eb1, ew2, eb2, ew3, eb3,
     dw1, db1, dw2, db2, dw3, db3, mw1, mb1, mw2, mb2) = params
    xm = x * mask
    concat = jnp.concatenate([xm, mask], axis=1)
    h = jax.nn.relu(concat @ ew1 + eb1)
    h = jax.nn.relu(h @ ew2 + eb2)
    latent = jax.nn.relu(h @ ew3 + eb3)
    d = jax.nn.relu(latent @ dw1 + db1)
    d = jax.nn.relu(d @ dw2 + db2)
    c = d @ dw3 + db3
    cons = jnp.where(bin_mask > 0.5, jax.nn.sigmoid(c),
                     jnp.where(pos_mask > 0.5, jax.nn.softplus(c), c))
    p = jax.nn.sigmoid(jax.nn.relu(latent @ mw1 + mb1) @ mw2 + mb2)
    return cons, p


if __name__ == "__main__":
    B = 8            # batch (small demo; kernel tiles/pads to TB multiples of 8)
    D = 16           # input_size
    L = 3            # latent_dim default

    key = jax.random.PRNGKey(0)
    k_x, k_m, k_p = jax.random.split(key, 3)

    x = jax.random.normal(k_x, (B, D), jnp.float32)
    mask = (jax.random.uniform(k_m, (B, D)) > 0.3).astype(jnp.float32)

    types_list = [
        ("binary", [0, 1, 2, 3]),
        ("real_positive", [4, 5, 6, 7]),
        ("real", [8, 9, 10, 11, 12, 13, 14, 15]),
    ]
    bin_mask, pos_mask = build_type_masks(types_list, D)
    params = build_params(k_p, D, L)

    constructed, p = dae_forward(x, mask, params, bin_mask, pos_mask)
    jax.block_until_ready((constructed, p))

    # sanity check against pure-JAX reference
    ref_cons, ref_p = reference_forward(x, mask, params, bin_mask, pos_mask)
    assert constructed.shape == (B, D) and p.shape == (B, 1)
    assert jnp.allclose(constructed, ref_cons, atol=1e-5, rtol=1e-5)
    assert jnp.allclose(p, ref_p, atol=1e-5, rtol=1e-5)

    print("KERNEL_OK")
</pallas_src>

<mosaic_0001>
module attributes {stable_mosaic.version = 11 : i64} {
  func.func @dae_kernel(%arg0: i32, %arg1: memref<8x128xf32, #tpu.memory_space<vmem>>, %arg2: memref<8x128xf32, #tpu.memory_space<vmem>>, %arg3: memref<128x128xf32, #tpu.memory_space<vmem>>, %arg4: memref<128x128xf32, #tpu.memory_space<vmem>>, %arg5: memref<1x128xf32, #tpu.memory_space<vmem>>, %arg6: memref<128x64xf32, #tpu.memory_space<vmem>>, %arg7: memref<1x64xf32, #tpu.memory_space<vmem>>, %arg8: memref<64x8xf32, #tpu.memory_space<vmem>>, %arg9: memref<1x8xf32, #tpu.memory_space<vmem>>, %arg10: memref<8x64xf32, #tpu.memory_space<vmem>>, %arg11: memref<1x64xf32, #tpu.memory_space<vmem>>, %arg12: memref<64x128xf32, #tpu.memory_space<vmem>>, %arg13: memref<1x128xf32, #tpu.memory_space<vmem>>, %arg14: memref<128x128xf32, #tpu.memory_space<vmem>>, %arg15: memref<1x128xf32, #tpu.memory_space<vmem>>, %arg16: memref<8x128xf32, #tpu.memory_space<vmem>>, %arg17: memref<1x128xf32, #tpu.memory_space<vmem>>, %arg18: memref<128x128xf32, #tpu.memory_space<vmem>>, %arg19: memref<1x128xf32, #tpu.memory_space<vmem>>, %arg20: memref<1x128xf32, #tpu.memory_space<vmem>>, %arg21: memref<1x128xf32, #tpu.memory_space<vmem>>, %arg22: memref<8x128xf32, #tpu.memory_space<vmem>>, %arg23: memref<8x128xf32, #tpu.memory_space<vmem>>) attributes {dimension_semantics = [#tpu.dimension_semantics<parallel>], iteration_bounds = array<i64: 1>, scalar_prefetch = 0 : i64, scratch_operands = 0 : i64, tpu.core_type = #tpu.core_type<tc>, window_params = [{transform_indices = @transform_0, window_bounds = array<i64: 8, 128>}, {transform_indices = @transform_1, window_bounds = array<i64: 8, 128>}, {pipeline_mode = #tpu.pipeline_mode<synchronous>, transform_indices = @transform_2, window_bounds = array<i64: 128, 128>}, {pipeline_mode = #tpu.pipeline_mode<synchronous>, transform_indices = @transform_3, window_bounds = array<i64: 128, 128>}, {pipeline_mode = #tpu.pipeline_mode<synchronous>, transform_indices = @transform_4, window_bounds = array<i64: 1, 128>}, {pipeline_mode = #tpu.pipeline_mode<synchronous>, transform_indices = @transform_5, window_bounds = array<i64: 128, 64>}, {pipeline_mode = #tpu.pipeline_mode<synchronous>, transform_indices = @transform_6, window_bounds = array<i64: 1, 64>}, {pipeline_mode = #tpu.pipeline_mode<synchronous>, transform_indices = @transform_7, window_bounds = array<i64: 64, 8>}, {pipeline_mode = #tpu.pipeline_mode<synchronous>, transform_indices = @transform_8, window_bounds = array<i64: 1, 8>}, {pipeline_mode = #tpu.pipeline_mode<synchronous>, transform_indices = @transform_9, window_bounds = array<i64: 8, 64>}, {pipeline_mode = #tpu.pipeline_mode<synchronous>, transform_indices = @transform_10, window_bounds = array<i64: 1, 64>}, {pipeline_mode = #tpu.pipeline_mode<synchronous>, transform_indices = @transform_11, window_bounds = array<i64: 64, 128>}, {pipeline_mode = #tpu.pipeline_mode<synchronous>, transform_indices = @transform_12, window_bounds = array<i64: 1, 128>}, {pipeline_mode = #tpu.pipeline_mode<synchronous>, transform_indices = @transform_13, window_bounds = array<i64: 128, 128>}, {pipeline_mode = #tpu.pipeline_mode<synchronous>, transform_indices = @transform_14, window_bounds = array<i64: 1, 128>}, {pipeline_mode = #tpu.pipeline_mode<synchronous>, transform_indices = @transform_15, window_bounds = array<i64: 8, 128>}, {pipeline_mode = #tpu.pipeline_mode<synchronous>, transform_indices = @transform_16, window_bounds = array<i64: 1, 128>}, {pipeline_mode = #tpu.pipeline_mode<synchronous>, transform_indices = @transform_17, window_bounds = array<i64: 128, 128>}, {pipeline_mode = #tpu.pipeline_mode<synchronous>, transform_indices = @transform_18, window_bounds = array<i64: 1, 128>}, {pipeline_mode = #tpu.pipeline_mode<synchronous>, transform_indices = @transform_19, window_bounds = array<i64: 1, 128>}, {pipeline_mode = #tpu.pipeline_mode<synchronous>, transform_indices = @transform_20, window_bounds = array<i64: 1, 128>}, {transform_indices = @transform_21, window_bounds = array<i64: 8, 128>}, {transform_indices = @transform_22, window_bounds = array<i64: 8, 128>}]} {
    %c0 = arith.constant 0 : index
    %c0_0 = arith.constant 0 : index
    %0 = vector.load %arg2[%c0, %c0_0] : memref<8x128xf32, #tpu.memory_space<vmem>>, vector<8x128xf32>
    %c0_1 = arith.constant 0 : index
    %c0_2 = arith.constant 0 : index
    %1 = vector.load %arg1[%c0_1, %c0_2] : memref<8x128xf32, #tpu.memory_space<vmem>>, vector<8x128xf32>
    %2 = arith.mulf %1, %0 : vector<8x128xf32>
    %c0_3 = arith.constant 0 : index
    %c0_4 = arith.constant 0 : index
    %3 = vector.load %arg3[%c0_3, %c0_4] : memref<128x128xf32, #tpu.memory_space<vmem>>, vector<128x128xf32>
    %cst = arith.constant dense<0.000000e+00> : vector<8x128xf32>
    %4 = tpu.matmul %2, %3, %cst {dimension_numbers = #tpu.dot_dimension_numbers<[1], [0], [0], [1], [0, 0, 1, 1], [], []>} : vector<8x128xf32>, vector<128x128xf32>, vector<8x128xf32> -> vector<8x128xf32>
    %c0_5 = arith.constant 0 : index
    %c0_6 = arith.constant 0 : index
    %5 = vector.load %arg4[%c0_5, %c0_6] : memref<128x128xf32, #tpu.memory_space<vmem>>, vector<128x128xf32>
    %cst_7 = arith.constant dense<0.000000e+00> : vector<8x128xf32>
    %6 = tpu.matmul %0, %5, %cst_7 {dimension_numbers = #tpu.dot_dimension_numbers<[1], [0], [0], [1], [0, 0, 1, 1], [], []>} : vector<8x128xf32>, vector<128x128xf32>, vector<8x128xf32> -> vector<8x128xf32>
    %7 = arith.addf %4, %6 : vector<8x128xf32>
    %c0_8 = arith.constant 0 : index
    %c0_9 = arith.constant 0 : index
    %8 = vector.load %arg5[%c0_8, %c0_9] : memref<1x128xf32, #tpu.memory_space<vmem>>, vector<1x128xf32>
    %9 = vector.broadcast %8 : vector<1x128xf32> to vector<8x128xf32>
    %10 = arith.addf %7, %9 : vector<8x128xf32>
    %cst_10 = arith.constant 0.000000e+00 : f32
    %11 = vector.broadcast %cst_10 : f32 to vector<8x128xf32>
    %12 = arith.maximumf %10, %11 : vector<8x128xf32>
    %c0_11 = arith.constant 0 : index
    %c0_12 = arith.constant 0 : index
    %13 = vector.load %arg6[%c0_11, %c0_12] : memref<128x64xf32, #tpu.memory_space<vmem>>, vector<128x64xf32>
    %cst_13 = arith.constant dense<0.000000e+00> : vector<8x64xf32>
    %14 = tpu.matmul %12, %13, %cst_13 {dimension_numbers = #tpu.dot_dimension_numbers<[1], [0], [0], [1], [0, 0, 1, 1], [], []>} : vector<8x128xf32>, vector<128x64xf32>, vector<8x64xf32> -> vector<8x64xf32>
    %c0_14 = arith.constant 0 : index
    %c0_15 = arith.constant 0 : index
    %15 = vector.load %arg7[%c0_14, %c0_15] : memref<1x64xf32, #tpu.memory_space<vmem>>, vector<1x64xf32>
    %16 = vector.broadcast %15 : vector<1x64xf32> to vector<8x64xf32>
    %17 = arith.addf %14, %16 : vector<8x64xf32>
    %cst_16 = arith.constant 0.000000e+00 : f32
    %18 = vector.broadcast %cst_16 : f32 to vector<8x64xf32>
    %19 = arith.maximumf %17, %18 : vector<8x64xf32>
    %c0_17 = arith.constant 0 : index
    %c0_18 = arith.constant 0 : index
    %20 = vector.load %arg8[%c0_17, %c0_18] : memref<64x8xf32, #tpu.memory_space<vmem>>, vector<64x8xf32>
    %cst_19 = arith.constant dense<0.000000e+00> : vector<8x8xf32>
    %21 = tpu.matmul %19, %20, %cst_19 {dimension_numbers = #tpu.dot_dimension_numbers<[1], [0], [0], [1], [0, 0, 1, 1], [], []>} : vector<8x64xf32>, vector<64x8xf32>, vector<8x8xf32> -> vector<8x8xf32>
    %c0_20 = arith.constant 0 : index
    %c0_21 = arith.constant 0 : index
    %22 = vector.load %arg9[%c0_20, %c0_21] : memref<1x8xf32, #tpu.memory_space<vmem>>, vector<1x8xf32>
    %23 = vector.broadcast %22 : vector<1x8xf32> to vector<8x8xf32>
    %24 = arith.addf %21, %23 : vector<8x8xf32>
    %cst_22 = arith.constant 0.000000e+00 : f32
    %25 = vector.broadcast %cst_22 : f32 to vector<8x8xf32>
    %26 = arith.maximumf %24, %25 : vector<8x8xf32>
    %c0_23 = arith.constant 0 : index
    %c0_24 = arith.constant 0 : index
    %27 = vector.load %arg10[%c0_23, %c0_24] : memref<8x64xf32, #tpu.memory_space<vmem>>, vector<8x64xf32>
    %cst_25 = arith.constant dense<0.000000e+00> : vector<8x64xf32>
    %28 = tpu.matmul %26, %27, %cst_25 {dimension_numbers = #tpu.dot_dimension_numbers<[1], [0], [0], [1], [0, 0, 1, 1], [], []>} : vector<8x8xf32>, vector<8x64xf32>, vector<8x64xf32> -> vector<8x64xf32>
    %c0_26 = arith.constant 0 : index
    %c0_27 = arith.constant 0 : index
    %29 = vector.load %arg11[%c0_26, %c0_27] : memref<1x64xf32, #tpu.memory_space<vmem>>, vector<1x64xf32>
    %30 = vector.broadcast %29 : vector<1x64xf32> to vector<8x64xf32>
    %31 = arith.addf %28, %30 : vector<8x64xf32>
    %cst_28 = arith.constant 0.000000e+00 : f32
    %32 = vector.broadcast %cst_28 : f32 to vector<8x64xf32>
    %33 = arith.maximumf %31, %32 : vector<8x64xf32>
    %c0_29 = arith.constant 0 : index
    %c0_30 = arith.constant 0 : index
    %34 = vector.load %arg12[%c0_29, %c0_30] : memref<64x128xf32, #tpu.memory_space<vmem>>, vector<64x128xf32>
    %cst_31 = arith.constant dense<0.000000e+00> : vector<8x128xf32>
    %35 = tpu.matmul %33, %34, %cst_31 {dimension_numbers = #tpu.dot_dimension_numbers<[1], [0], [0], [1], [0, 0, 1, 1], [], []>} : vector<8x64xf32>, vector<64x128xf32>, vector<8x128xf32> -> vector<8x128xf32>
    %c0_32 = arith.constant 0 : index
    %c0_33 = arith.constant 0 : index
    %36 = vector.load %arg13[%c0_32, %c0_33] : memref<1x128xf32, #tpu.memory_space<vmem>>, vector<1x128xf32>
    %37 = vector.broadcast %36 : vector<1x128xf32> to vector<8x128xf32>
    %38 = arith.addf %35, %37 : vector<8x128xf32>
    %cst_34 = arith.constant 0.000000e+00 : f32
    %39 = vector.broadcast %cst_34 : f32 to vector<8x128xf32>
    %40 = arith.maximumf %38, %39 : vector<8x128xf32>
    %c0_35 = arith.constant 0 : index
    %c0_36 = arith.constant 0 : index
    %41 = vector.load %arg14[%c0_35, %c0_36] : memref<128x128xf32, #tpu.memory_space<vmem>>, vector<128x128xf32>
    %cst_37 = arith.constant dense<0.000000e+00> : vector<8x128xf32>
    %42 = tpu.matmul %40, %41, %cst_37 {dimension_numbers = #tpu.dot_dimension_numbers<[1], [0], [0], [1], [0, 0, 1, 1], [], []>} : vector<8x128xf32>, vector<128x128xf32>, vector<8x128xf32> -> vector<8x128xf32>
    %c0_38 = arith.constant 0 : index
    %c0_39 = arith.constant 0 : index
    %43 = vector.load %arg15[%c0_38, %c0_39] : memref<1x128xf32, #tpu.memory_space<vmem>>, vector<1x128xf32>
    %44 = vector.broadcast %43 : vector<1x128xf32> to vector<8x128xf32>
    %45 = arith.addf %42, %44 : vector<8x128xf32>
    %46 = math.absf %45 : vector<8x128xf32>
    %cst_40 = arith.constant 0.000000e+00 : f32
    %47 = vector.broadcast %cst_40 : f32 to vector<8x128xf32>
    %48 = arith.subf %47, %46 : vector<8x128xf32>
    %49 = math.exp %48 : vector<8x128xf32>
    %cst_41 = arith.constant 1.000000e+00 : f32
    %50 = vector.broadcast %cst_41 : f32 to vector<8x128xf32>
    %51 = arith.addf %50, %49 : vector<8x128xf32>
    %cst_42 = arith.constant 1.000000e+00 : f32
    %52 = vector.broadcast %cst_42 : f32 to vector<8x128xf32>
    %53 = arith.divf %52, %51 : vector<8x128xf32>
    %cst_43 = arith.constant 0.000000e+00 : f32
    %54 = vector.broadcast %cst_43 : f32 to vector<8x128xf32>
    %55 = arith.cmpf oge, %45, %54 : vector<8x128xf32>
    %56 = arith.mulf %49, %53 : vector<8x128xf32>
    %57 = arith.select %55, %53, %56 : vector<8x128xi1>, vector<8x128xf32>
    %cst_44 = arith.constant 0.000000e+00 : f32
    %58 = vector.broadcast %cst_44 : f32 to vector<8x128xf32>
    %59 = arith.maximumf %45, %58 : vector<8x128xf32>
    %60 = math.log1p %49 : vector<8x128xf32>
    %61 = arith.addf %59, %60 : vector<8x128xf32>
    %c0_45 = arith.constant 0 : index
    %c0_46 = arith.constant 0 : index
    %62 = vector.load %arg20[%c0_45, %c0_46] : memref<1x128xf32, #tpu.memory_space<vmem>>, vector<1x128xf32>
    %c0_47 = arith.constant 0 : index
    %c0_48 = arith.constant 0 : index
    %63 = vector.load %arg21[%c0_47, %c0_48] : memref<1x128xf32, #tpu.memory_space<vmem>>, vector<1x128xf32>
    %cst_49 = arith.constant 5.000000e-01 : f32
    %64 = vector.broadcast %cst_49 : f32 to vector<1x128xf32>
    %65 = arith.cmpf ogt, %62, %64 : vector<1x128xf32>
    %cst_50 = arith.constant 5.000000e-01 : f32
    %66 = vector.broadcast %cst_50 : f32 to vector<1x128xf32>
    %67 = arith.cmpf ogt, %63, %66 : vector<1x128xf32>
    %68 = vector.shape_cast %67 : vector<1x128xi1> to vector<1x128xi1>
    %69 = vector.broadcast %68 : vector<1x128xi1> to vector<8x128xi1>
    %70 = arith.select %69, %61, %45 : vector<8x128xi1>, vector<8x128xf32>
    %71 = vector.shape_cast %65 : vector<1x128xi1> to vector<1x128xi1>
    %72 = vector.broadcast %71 : vector<1x128xi1> to vector<8x128xi1>
    %73 = arith.select %72, %57, %70 : vector<8x128xi1>, vector<8x128xf32>
    %c0_51 = arith.constant 0 : index
    %c0_52 = arith.constant 0 : index
    %74 = vector.load %arg22[%c0_51, %c0_52] : memref<8x128xf32, #tpu.memory_space<vmem>>, vector<8x128xf32>
    tpu.vector_store %arg22[%c0_51, %c0_52], %73 {strides = array<i32>} : memref<8x128xf32, #tpu.memory_space<vmem>>, vector<8x128xf32>,
    %c0_53 = arith.constant 0 : index
    %c0_54 = arith.constant 0 : index
    %75 = vector.load %arg16[%c0_53, %c0_54] : memref<8x128xf32, #tpu.memory_space<vmem>>, vector<8x128xf32>
    %cst_55 = arith.constant dense<0.000000e+00> : vector<8x128xf32>
    %76 = tpu.matmul %26, %75, %cst_55 {dimension_numbers = #tpu.dot_dimension_numbers<[1], [0], [0], [1], [0, 0, 1, 1], [], []>} : vector<8x8xf32>, vector<8x128xf32>, vector<8x128xf32> -> vector<8x128xf32>
    %c0_56 = arith.constant 0 : index
    %c0_57 = arith.constant 0 : index
    %77 = vector.load %arg17[%c0_56, %c0_57] : memref<1x128xf32, #tpu.memory_space<vmem>>, vector<1x128xf32>
    %78 = vector.broadcast %77 : vector<1x128xf32> to vector<8x128xf32>
    %79 = arith.addf %76, %78 : vector<8x128xf32>
    %cst_58 = arith.constant 0.000000e+00 : f32
    %80 = vector.broadcast %cst_58 : f32 to vector<8x128xf32>
    %81 = arith.maximumf %79, %80 : vector<8x128xf32>
    %c0_59 = arith.constant 0 : index
    %c0_60 = arith.constant 0 : index
    %82 = vector.load %arg18[%c0_59, %c0_60] : memref<128x128xf32, #tpu.memory_space<vmem>>, vector<128x128xf32>
    %cst_61 = arith.constant dense<0.000000e+00> : vector<8x128xf32>
    %83 = tpu.matmul %81, %82, %cst_61 {dimension_numbers = #tpu.dot_dimension_numbers<[1], [0], [0], [1], [0, 0, 1, 1], [], []>} : vector<8x128xf32>, vector<128x128xf32>, vector<8x128xf32> -> vector<8x128xf32>
    %c0_62 = arith.constant 0 : index
    %c0_63 = arith.constant 0 : index
    %84 = vector.load %arg19[%c0_62, %c0_63] : memref<1x128xf32, #tpu.memory_space<vmem>>, vector<1x128xf32>
    %85 = vector.broadcast %84 : vector<1x128xf32> to vector<8x128xf32>
    %86 = arith.addf %83, %85 : vector<8x128xf32>
    %87 = math.absf %86 : vector<8x128xf32>
    %cst_64 = arith.constant 0.000000e+00 : f32
    %88 = vector.broadcast %cst_64 : f32 to vector<8x128xf32>
    %89 = arith.subf %88, %87 : vector<8x128xf32>
    %90 = math.exp %89 : vector<8x128xf32>
    %cst_65 = arith.constant 1.000000e+00 : f32
    %91 = vector.broadcast %cst_65 : f32 to vector<8x128xf32>
    %92 = arith.addf %91, %90 : vector<8x128xf32>
    %cst_66 = arith.constant 1.000000e+00 : f32
    %93 = vector.broadcast %cst_66 : f32 to vector<8x128xf32>
    %94 = arith.divf %93, %92 : vector<8x128xf32>
    %cst_67 = arith.constant 0.000000e+00 : f32
    %95 = vector.broadcast %cst_67 : f32 to vector<8x128xf32>
    %96 = arith.cmpf oge, %86, %95 : vector<8x128xf32>
    %97 = arith.mulf %90, %94 : vector<8x128xf32>
    %98 = arith.select %96, %94, %97 : vector<8x128xi1>, vector<8x128xf32>
    %c0_68 = arith.constant 0 : index
    %c0_69 = arith.constant 0 : index
    %99 = vector.load %arg23[%c0_68, %c0_69] : memref<8x128xf32, #tpu.memory_space<vmem>>, vector<8x128xf32>
    tpu.vector_store %arg23[%c0_68, %c0_69], %98 {strides = array<i32>} : memref<8x128xf32, #tpu.memory_space<vmem>>, vector<8x128xf32>,
    return
  }
  func.func @transform_0(%arg0: i32) -> (i32, i32) {
    %c0_i32 = arith.constant 0 : i32
    %c0_i32_0 = arith.constant 0 : i32
    return %arg0, %c0_i32 : i32, i32
  }
  func.func @transform_1(%arg0: i32) -> (i32, i32) {
    %c0_i32 = arith.constant 0 : i32
    %c0_i32_0 = arith.constant 0 : i32
    return %arg0, %c0_i32 : i32, i32
  }
  func.func @transform_2(%arg0: i32) -> (i32, i32) {
    %c0_i32 = arith.constant 0 : i32
    %c0_i32_0 = arith.constant 0 : i32
    %c0_i32_1 = arith.constant 0 : i32
    return %c0_i32, %c0_i32_0 : i32, i32
  }
  func.func @transform_3(%arg0: i32) -> (i32, i32) {
    %c0_i32 = arith.constant 0 : i32
    %c0_i32_0 = arith.constant 0 : i32
    %c0_i32_1 = arith.constant 0 : i32
    return %c0_i32, %c0_i32_0 : i32, i32
  }
  func.func @transform_4(%arg0: i32) -> (i32, i32) {
    %c0_i32 = arith.constant 0 : i32
    %c0_i32_0 = arith.constant 0 : i32
    %c0_i32_1 = arith.constant 0 : i32
    return %c0_i32, %c0_i32_0 : i32, i32
  }
  func.func @transform_5(%arg0: i32) -> (i32, i32) {
    %c0_i32 = arith.constant 0 : i32
    %c0_i32_0 = arith.constant 0 : i32
    %c0_i32_1 = arith.constant 0 : i32
    return %c0_i32, %c0_i32_0 : i32, i32
  }
  func.func @transform_6(%arg0: i32) -> (i32, i32) {
    %c0_i32 = arith.constant 0 : i32
    %c0_i32_0 = arith.constant 0 : i32
    %c0_i32_1 = arith.constant 0 : i32
    return %c0_i32, %c0_i32_0 : i32, i32
  }
  func.func @transform_7(%arg0: i32) -> (i32, i32) {
    %c0_i32 = arith.constant 0 : i32
    %c0_i32_0 = arith.constant 0 : i32
    %c0_i32_1 = arith.constant 0 : i32
    return %c0_i32, %c0_i32_0 : i32, i32
  }
  func.func @transform_8(%arg0: i32) -> (i32, i32) {
    %c0_i32 = arith.constant 0 : i32
    %c0_i32_0 = arith.constant 0 : i32
    %c0_i32_1 = arith.constant 0 : i32
    return %c0_i32, %c0_i32_0 : i32, i32
  }
  func.func @transform_9(%arg0: i32) -> (i32, i32) {
    %c0_i32 = arith.constant 0 : i32
    %c0_i32_0 = arith.constant 0 : i32
    %c0_i32_1 = arith.constant 0 : i32
    return %c0_i32, %c0_i32_0 : i32, i32
  }
  func.func @transform_10(%arg0: i32) -> (i32, i32) {
    %c0_i32 = arith.constant 0 : i32
    %c0_i32_0 = arith.constant 0 : i32
    %c0_i32_1 = arith.constant 0 : i32
    return %c0_i32, %c0_i32_0 : i32, i32
  }
  func.func @transform_11(%arg0: i32) -> (i32, i32) {
    %c0_i32 = arith.constant 0 : i32
    %c0_i32_0 = arith.constant 0 : i32
    %c0_i32_1 = arith.constant 0 : i32
    return %c0_i32, %c0_i32_0 : i32, i32
  }
  func.func @transform_12(%arg0: i32) -> (i32, i32) {
    %c0_i32 = arith.constant 0 : i32
    %c0_i32_0 = arith.constant 0 : i32
    %c0_i32_1 = arith.constant 0 : i32
    return %c0_i32, %c0_i32_0 : i32, i32
  }
  func.func @transform_13(%arg0: i32) -> (i32, i32) {
    %c0_i32 = arith.constant 0 : i32
    %c0_i32_0 = arith.constant 0 : i32
    %c0_i32_1 = arith.constant 0 : i32
    return %c0_i32, %c0_i32_0 : i32, i32
  }
  func.func @transform_14(%arg0: i32) -> (i32, i32) {
    %c0_i32 = arith.constant 0 : i32
    %c0_i32_0 = arith.constant 0 : i32
    %c0_i32_1 = arith.constant 0 : i32
    return %c0_i32, %c0_i32_0 : i32, i32
  }
  func.func @transform_15(%arg0: i32) -> (i32, i32) {
    %c0_i32 = arith.constant 0 : i32
    %c0_i32_0 = arith.constant 0 : i32
    %c0_i32_1 = arith.constant 0 : i32
    return %c0_i32, %c0_i32_0 : i32, i32
  }
  func.func @transform_16(%arg0: i32) -> (i32, i32) {
    %c0_i32 = arith.constant 0 : i32
    %c0_i32_0 = arith.constant 0 : i32
    %c0_i32_1 = arith.constant 0 : i32
    return %c0_i32, %c0_i32_0 : i32, i32
  }
  func.func @transform_17(%arg0: i32) -> (i32, i32) {
    %c0_i32 = arith.constant 0 : i32
    %c0_i32_0 = arith.constant 0 : i32
    %c0_i32_1 = arith.constant 0 : i32
    return %c0_i32, %c0_i32_0 : i32, i32
  }
  func.func @transform_18(%arg0: i32) -> (i32, i32) {
    %c0_i32 = arith.constant 0 : i32
    %c0_i32_0 = arith.constant 0 : i32
    %c0_i32_1 = arith.constant 0 : i32
    return %c0_i32, %c0_i32_0 : i32, i32
  }
  func.func @transform_19(%arg0: i32) -> (i32, i32) {
    %c0_i32 = arith.constant 0 : i32
    %c0_i32_0 = arith.constant 0 : i32
    %c0_i32_1 = arith.constant 0 : i32
    return %c0_i32, %c0_i32_0 : i32, i32
  }
  func.func @transform_20(%arg0: i32) -> (i32, i32) {
    %c0_i32 = arith.constant 0 : i32
    %c0_i32_0 = arith.constant 0 : i32
    %c0_i32_1 = arith.constant 0 : i32
    return %c0_i32, %c0_i32_0 : i32, i32
  }
  func.func @transform_21(%arg0: i32) -> (i32, i32) {
    %c0_i32 = arith.constant 0 : i32
    %c0_i32_0 = arith.constant 0 : i32
    return %arg0, %c0_i32 : i32, i32
  }
  func.func @transform_22(%arg0: i32) -> (i32, i32) {
    %c0_i32 = arith.constant 0 : i32
    %c0_i32_0 = arith.constant 0 : i32
    return %arg0, %c0_i32 : i32, i32
  }
}

</mosaic_0001>

<bundles_post_ra>
// kernel: dae_forward.1
= control target key start
LH: loop header
LB: loop body
LE: loop exit
PB: predicated region body
PF: predicated region fallthrough
CT: control target
= control target key end

     0   :  { %s2007_s0 = inlined_call_operand.vmem [shape: f32[8,128], index: 0, kind: input, shape index: {}]   ;;  %s2008_s1 = inlined_call_operand.vmem [shape: f32[8,128], index: 1, kind: input, shape index: {}]   ;;  %s2009_s2 = inlined_call_operand.vmem [shape: f32[128,128], index: 2, kind: input, shape index: {}]   ;;  %s2010_s3 = inlined_call_operand.vmem [shape: f32[128,128], index: 3, kind: input, shape index: {}]   ;;  %s2011_s4 = inlined_call_operand.vmem [shape: f32[1,128], index: 4, kind: input, shape index: {}]   ;;  %s2012_s5 = inlined_call_operand.vmem [shape: f32[128,64], index: 5, kind: input, shape index: {}]   ;;  %s2013_s6 = inlined_call_operand.vmem [shape: f32[1,64], index: 6, kind: input, shape index: {}]   ;;  %s2014_s7 = inlined_call_operand.vmem [shape: f32[64,8], index: 7, kind: input, shape index: {}]   ;;  %s2015_s8 = inlined_call_operand.vmem [shape: f32[1,8], index: 8, kind: input, shape index: {}]   ;;  %s2016_s9 = inlined_call_operand.vmem [shape: f32[8,64], index: 9, kind: input, shape index: {}]   ;;  %s2017_s10 = inlined_call_operand.vmem [shape: f32[1,64], index: 10, kind: input, shape index: {}]   ;;  %s2018_s11 = inlined_call_operand.vmem [shape: f32[64,128], index: 11, kind: input, shape index: {}]   ;;  %s2019_s12 = inlined_call_operand.vmem [shape: f32[1,128], index: 12, kind: input, shape index: {}]   ;;  %s2020_s13 = inlined_call_operand.vmem [shape: f32[128,128], index: 13, kind: input, shape index: {}]   ;;  %s2021_s14 = inlined_call_operand.vmem [shape: f32[1,128], index: 14, kind: input, shape index: {}]   ;;  %s2022_s15 = inlined_call_operand.vmem [shape: f32[8,128], index: 15, kind: input, shape index: {}]   ;;  %s2023_s16 = inlined_call_operand.vmem [shape: f32[1,128], index: 16, kind: input, shape index: {}]   ;;  %s2024_s17 = inlined_call_operand.vmem [shape: f32[128,128], index: 17, kind: input, shape index: {}]   ;;  %s2025_s18 = inlined_call_operand.vmem [shape: f32[1,128], index: 18, kind: input, shape index: {}]   ;;  %s2026_s19 = inlined_call_operand.vmem [shape: f32[1,128], index: 19, kind: input, shape index: {}]   ;;  %s2027_s20 = inlined_call_operand.vmem [shape: f32[1,128], index: 20, kind: input, shape index: {}]   ;;  %s2028_s21 = inlined_call_operand.hbm [shape: f32[8,128], index: 21, kind: output, shape index: {0}]   ;;  %s2029_s22 = inlined_call_operand.vmem [shape: f32[8,128], index: 22, kind: output, shape index: {1}]  }
   0x1   :  { %2033 = sst [smem:[#allocation5_spill]] %s2007_s0 }
   0x2   :  { %2034 = sst [smem:[#allocation6_spill]] %s2008_s1 }
   0x3   :  { %2035 = sst [smem:[#allocation7_spill]] %s2009_s2 }
   0x4   :  { %2036 = sst [smem:[#allocation8_spill]] %s2010_s3 }
   0x5   :  { %2037 = sst [smem:[#allocation9_spill]] %s2011_s4 }
   0x6   :  { %2038 = sst [smem:[#allocation10_spill]] %s2012_s5 }
   0x7   :  { %2039 = sst [smem:[#allocation11_spill]] %s2013_s6 }
   0x8   :  { %s2040_s29 = sld [smem:[#allocation8_spill]]  ;;  %s2041_s1 = sld [smem:[#allocation7_spill]]  ;;  %v1470_v3 = vmov 0.0|0.0   ;;  %vm1471_vm0 = vmmov 0   ;;  %v1472_v11 = vmov 0.0  }
   0x9   :  { %1287 = vmatprep.subr.bf16.mxu0 %v1470_v3  ;;  %1311 = vmatprep.subr.bf16.mxu1 %v1470_v3 }
   0xa   :  { %1096 = vmatprep.mubr.msk.f32.mxu0 %vm1471_vm0, %v1472_v11  ;;  %1131 = vmatprep.mubr.msk.f32.mxu1 %vm1471_vm0, %v1472_v11 }
   0xe   :  { %v90_v0 = vld [vmem:[%s2040_s29] sm:$0xff]  ;;  %v91_v1 = vld [vmem:[%s2040_s29 + $0x8] sm:$0xff]  ;;  %v92_v6 = vld [vmem:[%s2040_s29 + $0x10] sm:$0xff] }
   0xf   :  { %v74_v2 = vld [vmem:[%s2041_s1] sm:$0xff]  ;;  %v1288_v4 = vpack.c.bf16 %v91_v1, %v90_v0  ;;  %v75_v5 = vld [vmem:[%s2041_s1 + $0x8] sm:$0xff]  ;;  %v93_v7 = vld [vmem:[%s2040_s29 + $0x18] sm:$0xff] }
  0x10   :  { %v1312_v8 = vpack.c.bf16 %v75_v5, %v74_v2  ;;  %v76_v9 = vld [vmem:[%s2041_s1 + $0x10] sm:$0xff]  ;;  %v77_v10 = vld [vmem:[%s2041_s1 + $0x18] sm:$0xff]  ;;  %v1291_v12 = vpack.c.bf16 %v93_v7, %v92_v6  ;;  %v94_v14 = vld [vmem:[%s2040_s29 + $0x20] sm:$0xff] }
  0x11   :  { %1289 = vmatpush3.bf16.msra.mxu0 %v1288_v4  ;;  %v1315_v13 = vpack.c.bf16 %v77_v10, %v76_v9  ;;  %v95_v15 = vld [vmem:[%s2040_s29 + $0x28] sm:$0xff]  ;;  %v78_v16 = vld [vmem:[%s2041_s1 + $0x20] sm:$0xff]  ;;  %v96_v20 = vld [vmem:[%s2040_s29 + $0x30] sm:$0xff] }
  0x12   :  { %1313 = vmatpush3.bf16.msra.mxu1 %v1312_v8  ;;  %1290 = vmatprep.subr.bf16.mxu0 %v1470_v3  ;;  %v79_v17 = vld [vmem:[%s2041_s1 + $0x28] sm:$0xff]  ;;  %v1294_v18 = vpack.c.bf16 %v95_v15, %v94_v14  ;;  %v97_v21 = vld [vmem:[%s2040_s29 + $0x38] sm:$0xff]  ;;  %v80_v22 = vld [vmem:[%s2041_s1 + $0x30] sm:$0xff] }
  0x13   :  { %1314 = vmatprep.subr.bf16.mxu1 %v1470_v3  ;;  %v1318_v19 = vpack.c.bf16 %v79_v17, %v78_v16  ;;  %v81_v23 = vld [vmem:[%s2041_s1 + $0x38] sm:$0xff]  ;;  %v1297_v24 = vpack.c.bf16 %v97_v21, %v96_v20  ;;  %v98_v26 = vld [vmem:[%s2040_s29 + $0x40] sm:$0xff]  ;;  %v99_v27 = vld [vmem:[%s2040_s29 + $0x48] sm:$0xff] }
  0x14   :  { %v1321_v25 = vpack.c.bf16 %v81_v23, %v80_v22  ;;  %v82_v28 = vld [vmem:[%s2041_s1 + $0x40] sm:$0xff]  ;;  %v83_v29 = vld [vmem:[%s2041_s1 + $0x48] sm:$0xff]  ;;  %v1300_v30 = vpack.c.bf16 %v99_v27, %v98_v26 }
  0x15   :  { %1292 = vmatpush3.bf16.msra.mxu0 %v1291_v12 }
  0x16   :  { %1316 = vmatpush3.bf16.msra.mxu1 %v1315_v13  ;;  %1293 = vmatprep.subr.bf16.mxu0 %v1470_v3 }
  0x17   :  { %1317 = vmatprep.subr.bf16.mxu1 %v1470_v3 }
  0x19   :  { %1295 = vmatpush3.bf16.msra.mxu0 %v1294_v18 }
  0x1a   :  { %1319 = vmatpush3.bf16.msra.mxu1 %v1318_v19  ;;  %1296 = vmatprep.subr.bf16.mxu0 %v1470_v3 }
  0x1b   :  { %1320 = vmatprep.subr.bf16.mxu1 %v1470_v3 }
  0x1d   :  { %1298 = vmatpush3.bf16.msra.mxu0 %v1297_v24 }
  0x1e   :  { %28 = vsyncpa [#allocation3], 0  ;;  %1322 = vmatpush3.bf16.msra.mxu1 %v1321_v25  ;;  %1299 = vmatprep.subr.bf16.mxu0 %v1470_v3  ;;  %v1324_v31 = vpack.c.bf16 %v83_v29, %v82_v28  ;;  %v100_v32 = vld [vmem:[%s2040_s29 + $0x50] sm:$0xff]  ;;  %v101_v33 = vld [vmem:[%s2040_s29 + $0x58] sm:$0xff]  ;;  %s2042_s28 = sld [smem:[#allocation6_spill]]  ;;  %s2043_s4 = sld [smem:[#allocation5_spill]] }
  0x1f   :  { %1323 = vmatprep.subr.bf16.mxu1 %v1470_v3  ;;  %v84_v34 = vld [vmem:[%s2041_s1 + $0x50] sm:$0xff]  ;;  %v85_v35 = vld [vmem:[%s2041_s1 + $0x58] sm:$0xff]  ;;  %v1303_v36 = vpack.c.bf16 %v101_v33, %v100_v32  ;;  %v102_v38 = vld [vmem:[%s2040_s29 + $0x60] sm:$0xff]  ;;  %s2044_s5 = sld [smem:[#allocation10_spill]]  ;;  %vm364_vm1 = vcmask 523264   ;;  %vm447_vm2 = vcmask 64512  }
  0x20   :  { %v1327_v37 = vpack.c.bf16 %v85_v35, %v84_v34  ;;  %v103_v39 = vld [vmem:[%s2040_s29 + $0x68] sm:$0xff]  ;;  %v86_v40 = vld [vmem:[%s2041_s1 + $0x60] sm:$0xff]  ;;  %v104_v44 = vld [vmem:[%s2040_s29 + $0x70] sm:$0xff] }
  0x21   :  { %1301 = vmatpush3.bf16.msra.mxu0 %v1300_v30  ;;  %v87_v41 = vld [vmem:[%s2041_s1 + $0x68] sm:$0xff]  ;;  %v1306_v42 = vpack.c.bf16 %v103_v39, %v102_v38  ;;  %v105_v45 = vld [vmem:[%s2040_s29 + $0x78] sm:$0xff]  ;;  %v88_v46 = vld [vmem:[%s2041_s1 + $0x70] sm:$0xff] }
  0x22   :  { %1325 = vmatpush3.bf16.msra.mxu1 %v1324_v31  ;;  %1302 = vmatprep.subr.bf16.mxu0 %v1470_v3  ;;  %v1330_v43 = vpack.c.bf16 %v87_v41, %v86_v40  ;;  %v89_v47 = vld [vmem:[%s2041_s1 + $0x78] sm:$0xff]  ;;  %v1309_v48 = vpack.c.bf16 %v105_v45, %v104_v44  ;;  %v349_v15 = vld [vmem:[%s2014_s7] sm:$0xff]  ;;  %v350_v16 = vld [vmem:[%s2014_s7 + $0x8] sm:$0xff]  ;;  %s2045_s1 = sld [smem:[#allocation9_spill]] }
  0x23   :  { %1326 = vmatprep.subr.bf16.mxu1 %v1470_v3  ;;  %v1333_v50 = vpack.c.bf16 %v89_v47, %v88_v46  ;;  %v351_v17 = vld [vmem:[%s2014_s7 + $0x10] sm:$0xff]  ;;  %v1360_v18 = vpack.c.bf16 %v350_v16, %v349_v15  ;;  %v352_v19 = vld [vmem:[%s2014_s7 + $0x18] sm:$0xff]  ;;  %v353_v21 = vld [vmem:[%s2014_s7 + $0x20] sm:$0xff] }
  0x24   :  { %v71_v49 = vld [vmem:[%s2042_s28] sm:$0xff]  ;;  %v1363_v20 = vpack.c.bf16 %v352_v19, %v351_v17  ;;  %v354_v22 = vld [vmem:[%s2014_s7 + $0x28] sm:$0xff]  ;;  %v355_v32 = vld [vmem:[%s2014_s7 + $0x30] sm:$0xff]  ;;  %s2046_s28 = sld [smem:[#allocation11_spill]] }
  0x25   :  { %1304 = vmatpush3.bf16.msra.mxu0 %v1303_v36  ;;  %v72_v51 = vld [vmem:[%s2043_s4] sm:$0xff]  ;;  %v256_v53 = vld [vmem:[%s2044_s5 + $0x8] sm:$0xff]  ;;  %v257_v56 = vld [vmem:[%s2044_s5 + $0x10] sm:$0xff]  ;;  %v1366_v23 = vpack.c.bf16 %v354_v22, %v353_v21 }
  0x26   :  { %1328 = vmatpush3.bf16.msra.mxu1 %v1327_v37  ;;  %1305 = vmatprep.subr.bf16.mxu0 %v1470_v3  ;;  %v255_v52 = vld [vmem:[%s2044_s5] sm:$0xff]  ;;  %v73_v54 = vmul.f32 %v72_v51, %v71_v49  ;;  %v258_v57 = vld [vmem:[%s2044_s5 + $0x18] sm:$0xff]  ;;  %v260_v60 = vld [vmem:[%s2044_s5 + $0x28] sm:$0xff] }
  0x27   :  { %1329 = vmatprep.subr.bf16.mxu1 %v1470_v3  ;;  %v1336_v55 = vpack.c.bf16 %v256_v53, %v255_v52  ;;  %v1339_v58 = vpack.c.bf16 %v258_v57, %v257_v56  ;;  %v259_v59 = vld [vmem:[%s2044_s5 + $0x20] sm:$0xff]  ;;  %v261_v62 = vld [vmem:[%s2044_s5 + $0x30] sm:$0xff]  ;;  %v262_v63 = vld [vmem:[%s2044_s5 + $0x38] sm:$0xff] }
  0x28   :  { %v1342_v61 = vpack.c.bf16 %v260_v60, %v259_v59  ;;  %v1345_v0 = vpack.c.bf16 %v262_v63, %v261_v62  ;;  %v263_v1 = vld [vmem:[%s2044_s5 + $0x40] sm:$0xff]  ;;  %v264_v2 = vld [vmem:[%s2044_s5 + $0x48] sm:$0xff]  ;;  %v265_v5 = vld [vmem:[%s2044_s5 + $0x50] sm:$0xff] }
  0x29   :  { %1307 = vmatpush3.bf16.msra.mxu0 %v1306_v42  ;;  %v1348_v4 = vpack.c.bf16 %v264_v2, %v263_v1  ;;  %v266_v6 = vld [vmem:[%s2044_s5 + $0x58] sm:$0xff]  ;;  %v267_v8 = vld [vmem:[%s2044_s5 + $0x60] sm:$0xff]  ;;  %v268_v9 = vld [vmem:[%s2044_s5 + $0x68] sm:$0xff] }
  0x2a   :  { %1331 = vmatpush3.bf16.msra.mxu1 %v1330_v43  ;;  %1308 = vmatprep.subr.bf16.mxu0 %v1470_v3  ;;  %v1351_v7 = vpack.c.bf16 %v266_v6, %v265_v5  ;;  %v1354_v10 = vpack.c.bf16 %v268_v9, %v267_v8  ;;  %v269_v12 = vld [vmem:[%s2044_s5 + $0x70] sm:$0xff]  ;;  %v270_v13 = vld [vmem:[%s2044_s5 + $0x78] sm:$0xff]  ;;  %v945_v26 = vld [vmem:[%s2045_s1] ss:$0 sm:$0xff] }
  0x2b   :  { %1332 = vmatprep.subr.bf16.mxu1 %v1470_v3  ;;  %v1357_v14 = vpack.c.bf16 %v270_v13, %v269_v12  ;;  %v356_v33 = vld [vmem:[%s2014_s7 + $0x38] sm:$0xff]  ;;  %v946_v35 = vld [vmem:[%s2046_s28] ss:$0 sm:$0xff]  ;;  %v523_v42 = vld [vmem:[%s2018_s11 + $0x8] sm:$0xff] }
  0x2c   :  { %v1369_v34 = vpack.c.bf16 %v356_v33, %v355_v32  ;;  %v439_v40 = vld [vmem:[%s2016_s9] sm:$0xff]  ;;  %v524_v43 = vld [vmem:[%s2018_s11 + $0x10] sm:$0xff]  ;;  %v525_v45 = vld [vmem:[%s2018_s11 + $0x18] sm:$0xff] }
  0x2d   :  { %1310 = vmatpush3.bf16.msra.mxu0 %v1309_v48  ;;  %v522_v41 = vld [vmem:[%s2018_s11] sm:$0xff]  ;;  %v1375_v46 = vpack.c.bf16 %v525_v45, %v524_v43  ;;  %v527_v48 = vld [vmem:[%s2018_s11 + $0x28] sm:$0xff]  ;;  %v529_v56 = vld [vmem:[%s2018_s11 + $0x38] sm:$0xff] }
  0x2e   :  { %1334 = vmatpush3.bf16.msra.mxu1 %v1333_v50  ;;  %1335 = vmatprep.subr.bf16.mxu0 %v1470_v3  ;;  %v1372_v44 = vpack.c.bf16 %v523_v42, %v522_v41  ;;  %v526_v47 = vld [vmem:[%s2018_s11 + $0x20] sm:$0xff]  ;;  %v612_v59 = vld [vmem:[%s2020_s13 + $0x8] sm:$0xff]  ;;  %v613_v60 = vld [vmem:[%s2020_s13 + $0x10] sm:$0xff] }
  0x2f   :  { %1359 = vmatprep.subr.bf16.mxu1 %v1470_v3  ;;  %v947_v50 = vld [vmem:[%s2015_s8] ss:$0 sm:$0xff]  ;;  %v614_v62 = vld [vmem:[%s2020_s13 + $0x18] sm:$0xff]  ;;  %v616_v1 = vld [vmem:[%s2020_s13 + $0x28] sm:$0xff] }
  0x30   :  { %1097 = vmatmul.mubr.f32.vlgmr.msra.gmra.mrb[0].mxu0 %v71_v49  ;;  %v1378_v49 = vpack.c.bf16 %v527_v48, %v526_v47  ;;  %v1387_v63 = vpack.c.bf16 %v614_v62, %v613_v60  ;;  %v618_v5 = vld [vmem:[%s2020_s13 + $0x38] sm:$0xff]  ;;  %v620_v8 = vld [vmem:[%s2020_s13 + $0x48] sm:$0xff]  ;;  %v949_v17 = vld [vmem:[%s2017_s10] ss:$0 sm:$0xff] }
  0x31   :  { %1132 = vmatmul.mubr.f32.vlgmr.msra.gmra.mrb[0].mxu1 %v73_v54  ;;  %1337 = vmatpush3.bf16.msra.mxu0 %v1336_v55  ;;  %v528_v55 = vld [vmem:[%s2018_s11 + $0x30] sm:$0xff]  ;;  %v622_v12 = vld [vmem:[%s2020_s13 + $0x58] sm:$0xff]  ;;  %v624_v15 = vld [vmem:[%s2020_s13 + $0x68] sm:$0xff] }
  0x32   :  { %1338 = vmatprep.subr.bf16.mxu0 %v1470_v3  ;;  %1166 = vmatprep.mubr.msk.f32.mxu0 %vm1471_vm0, %v1472_v11  ;;  %v1381_v57 = vpack.c.bf16 %v529_v56, %v528_v55  ;;  %v744_v22 = vld [vmem:[%s2022_s15] sm:$0xff]  ;;  %v829_v32 = vld [vmem:[%s2024_s17 + $0x30] sm:$0xff]  ;;  %v626_v41 = vld [vmem:[%s2020_s13 + $0x78] sm:$0xff] }
  0x33   :  { %1185 = vmatprep.mubr.msk.f32.mxu1 %vm1471_vm0, %v1472_v11  ;;  %1361 = vmatpush3.bf16.msra.mxu1 %v1360_v18  ;;  %v835_v42 = vld [vmem:[%s2024_s17 + $0x60] sm:$0xff]  ;;  %v838_v47 = vld [vmem:[%s2024_s17 + $0x78] sm:$0xff] }
  0x34   :  { %1362 = vmatprep.subr.bf16.mxu1 %v1470_v3  ;;  %v956_v62 = vld [vmem:[%s2025_s18] ss:$0 sm:$0xff] }
  0x35   :  { %1340 = vmatpush3.bf16.msra.mxu0 %v1339_v58  ;;  %v611_v58 = vld [vmem:[%s2020_s13] sm:$0xff] }
  0x36   :  { %1341 = vmatprep.subr.bf16.mxu0 %v1470_v3 }
  0x37   :  { %1364 = vmatpush3.bf16.msra.mxu1 %v1363_v20 }
  0x38   :  { %1365 = vmatprep.subr.bf16.mxu1 %v1470_v3 }
  0x39   :  { %1343 = vmatpush3.bf16.msra.mxu0 %v1342_v61  ;;  %v1384_v61 = vpack.c.bf16 %v612_v59, %v611_v58 }
  0x3a   :  { %1344 = vmatprep.subr.bf16.mxu0 %v1470_v3 }
  0x3b   :  { %1367 = vmatpush3.bf16.msra.mxu1 %v1366_v23  ;;  %v823_v23 = vld [vmem:[%s2024_s17] sm:$0xff] }
  0x3c   :  { %1368 = vmatprep.subr.bf16.mxu1 %v1470_v3 }
  0x3d   :  { %1346 = vmatpush3.bf16.msra.mxu0 %v1345_v0  ;;  %v615_v0 = vld [vmem:[%s2020_s13 + $0x20] sm:$0xff] }
  0x3e   :  { %1347 = vmatprep.subr.bf16.mxu0 %v1470_v3  ;;  %v1390_v2 = vpack.c.bf16 %v616_v1, %v615_v0 }
  0x3f   :  { %1370 = vmatpush3.bf16.msra.mxu1 %v1369_v34  ;;  %v831_v34 = vld [vmem:[%s2024_s17 + $0x40] sm:$0xff] }
  0x40   :  { %1371 = vmatprep.subr.bf16.mxu1 %v1470_v3 }
  0x41   :  { %1349 = vmatpush3.bf16.msra.mxu0 %v1348_v4  ;;  %v617_v4 = vld [vmem:[%s2020_s13 + $0x30] sm:$0xff] }
  0x42   :  { %1350 = vmatprep.subr.bf16.mxu0 %v1470_v3  ;;  %v1393_v6 = vpack.c.bf16 %v618_v5, %v617_v4 }
  0x45   :  { %1352 = vmatpush3.bf16.msra.mxu0 %v1351_v7  ;;  %v619_v7 = vld [vmem:[%s2020_s13 + $0x40] sm:$0xff] }
  0x46   :  { %1353 = vmatprep.subr.bf16.mxu0 %v1470_v3  ;;  %v1396_v9 = vpack.c.bf16 %v620_v8, %v619_v7 }
  0x49   :  { %1355 = vmatpush3.bf16.msra.mxu0 %v1354_v10  ;;  %v621_v10 = vld [vmem:[%s2020_s13 + $0x50] sm:$0xff] }
  0x4a   :  { %1356 = vmatprep.subr.bf16.mxu0 %v1470_v3  ;;  %v1399_v13 = vpack.c.bf16 %v622_v12, %v621_v10  ;;  %v730_v12 = vlaneseq }
  0x4d   :  { %1358 = vmatpush3.bf16.msra.mxu0 %v1357_v14  ;;  %v623_v14 = vld [vmem:[%s2020_s13 + $0x60] sm:$0xff] }
  0x4e   :  { %1188 = vmatprep.subr.mxu0 %v1472_v11  ;;  %v1402_v16 = vpack.c.bf16 %v624_v15, %v623_v14  ;;  %v726_v14 = vld [vmem:[%s2027_s20] sm:$0x1] }
  0x4f   :  { %vm728_vm3 = vcmp.gt.f32.partialorder %v726_v14, 0.5 }
 0x103   :  { %v172_v24 = vpop.f32.mrb[0].mxu0 }
 0x104   :  { %v242_v25 = vpop.f32.mrb[0].mxu1  ;;  %v1098_v27 = vpop.f32.mrb[1].mxu0 }
 0x105   :  { %v243_v28 = vadd.f32 %v242_v25, %v172_v24  ;;  %v1133_v29 = vpop.f32.mrb[1].mxu1  ;;  %v824_v24 = vld [vmem:[%s2024_s17 + $0x8] sm:$0xff]  ;;  %v826_v27 = vld [vmem:[%s2024_s17 + $0x18] sm:$0xff] }
 0x106   :  { %v1408_v25 = vpack.c.bf16 %v824_v24, %v823_v23  ;;  %v827_v29 = vld [vmem:[%s2024_s17 + $0x20] sm:$0xff] }
 0x107   :  { %v253_v30 = vadd.f32 %v945_v26, %v243_v28  ;;  %v825_v26 = vld [vmem:[%s2024_s17 + $0x10] sm:$0xff] }
 0x108   :  { %v1411_v28 = vpack.c.bf16 %v826_v27, %v825_v26 }
 0x109   :  { %v254_v31 = vmax.f32 %v253_v30, 0.0  ;;  %v828_v30 = vld [vmem:[%s2024_s17 + $0x28] sm:$0xff] }
 0x10b   :  { %1167 = vmatmul.mubr.f32.vlgmr.msra.gmra.mrb[2].mxu0 %v254_v31  ;;  %v1414_v31 = vpack.c.bf16 %v828_v30, %v827_v29 }
 0x10c   :  { %1190 = vmatprep.mubr.msk.f32.mxu0 %vm1471_vm0, %v1472_v11  ;;  %1189 = vmatpush3.msra.mxu0 %v439_v40  ;;  %v625_v40 = vld [vmem:[%s2020_s13 + $0x70] sm:$0xff] }
 0x10d   :  { %1383 = vmatprep.subr.bf16.mxu0 %v1470_v3  ;;  %v1405_v43 = vpack.c.bf16 %v626_v41, %v625_v40 }
 0x1de   :  { %v344_v36 = vpop.f32.mrb[2].mxu0 }
 0x1df   :  { %v345_v37 = vadd.f32 %v946_v35, %v344_v36  ;;  %v1168_v38 = vpop.f32.mrb[3].mxu0  ;;  %v832_v35 = vld [vmem:[%s2024_s17 + $0x48] sm:$0xff] }
 0x1e0   :  { %v1420_v36 = vpack.c.bf16 %v832_v35, %v831_v34  ;;  %v834_v38 = vld [vmem:[%s2024_s17 + $0x58] sm:$0xff] }
 0x1e1   :  { %v348_v39 = vmax.f32 %v345_v37, 0.0  ;;  %v833_v37 = vld [vmem:[%s2024_s17 + $0x50] sm:$0xff] }
 0x1e3   :  { %1186 = vmatmul.mubr.msk.f32.vlgmr.msra.gmra.mrb[2].mxu1 %vm364_vm1, %v348_v39  ;;  %v1423_v39 = vpack.c.bf16 %v834_v38, %v833_v37 }
 0x1e4   :  { %1209 = vmatprep.mubr.msk.f32.mxu1 %vm1471_vm0, %v1472_v11  ;;  %1373 = vmatpush3.bf16.msra.mxu1 %v1372_v44  ;;  %v836_v44 = vld [vmem:[%s2024_s17 + $0x68] sm:$0xff] }
 0x1e5   :  { %1374 = vmatprep.subr.bf16.mxu1 %v1470_v3  ;;  %v1426_v45 = vpack.c.bf16 %v836_v44, %v835_v42 }
 0x1e8   :  { %1376 = vmatpush3.bf16.msra.mxu1 %v1375_v46  ;;  %v837_v46 = vld [vmem:[%s2024_s17 + $0x70] sm:$0xff] }
 0x1e9   :  { %1377 = vmatprep.subr.bf16.mxu1 %v1470_v3  ;;  %v1429_v48 = vpack.c.bf16 %v838_v47, %v837_v46 }
 0x1ec   :  { %1379 = vmatpush3.bf16.msra.mxu1 %v1378_v49  ;;  %v951_v49 = vld [vmem:[%s2019_s12] ss:$0 sm:$0xff] }
 0x1ed   :  { %1380 = vmatprep.subr.bf16.mxu1 %v1470_v3 }
 0x1f0   :  { %1382 = vmatpush3.bf16.msra.mxu1 %v1381_v57 }
 0x1f1   :  { %1247 = vmatprep.subr.mxu1 %v1472_v11 }
 0x2b6   :  { %v434_v51 = vpop.f32.mrb[2].mxu1 }
 0x2b7   :  { %v435_v52 = vadd.f32 %v947_v50, %v434_v51  ;;  %v1187_v53 = vpop.f32.mrb[3].mxu1 }
 0x2b8   :  { %v954_v53 = vld [vmem:[%s2023_s16] ss:$0 sm:$0xff] }
 0x2b9   :  { %v438_v54 = vmax.f32 %v435_v52, 0.0 }
 0x2bb   :  { %1191 = vmatmul.mubr.msk.f32.vlgmr.msra.gmra.mrb[4].mxu0 %vm447_vm2, %v438_v54 }
 0x2bc   :  { %1244 = vmatprep.mubr.msk.f32.mxu0 %vm1471_vm0, %v1472_v11  ;;  %1385 = vmatpush3.bf16.msra.mxu0 %v1384_v61 }
 0x2bd   :  { %1386 = vmatprep.subr.bf16.mxu0 %v1470_v3 }
 0x2c0   :  { %1388 = vmatpush3.bf16.msra.mxu0 %v1387_v63 }
 0x2c1   :  { %1389 = vmatprep.subr.bf16.mxu0 %v1470_v3 }
 0x2c4   :  { %1391 = vmatpush3.bf16.msra.mxu0 %v1390_v2 }
 0x2c5   :  { %1392 = vmatprep.subr.bf16.mxu0 %v1470_v3 }
 0x2c8   :  { %1394 = vmatpush3.bf16.msra.mxu0 %v1393_v6 }
 0x2c9   :  { %1395 = vmatprep.subr.bf16.mxu0 %v1470_v3 }
 0x2cc   :  { %1397 = vmatpush3.bf16.msra.mxu0 %v1396_v9 }
 0x2cd   :  { %1398 = vmatprep.subr.bf16.mxu0 %v1470_v3 }
 0x2d0   :  { %1400 = vmatpush3.bf16.msra.mxu0 %v1399_v13 }
 0x2d1   :  { %1401 = vmatprep.subr.bf16.mxu0 %v1470_v3 }
 0x2d4   :  { %1403 = vmatpush3.bf16.msra.mxu0 %v1402_v16  ;;  %v725_v16 = vld [vmem:[%s2026_s19] sm:$0x1]  ;;  %s1474_s19 = smov [#allocation2]  }
 0x2d5   :  { %1404 = vmatprep.subr.bf16.mxu0 %v1470_v3  ;;  %vm727_vm4 = vcmp.gt.f32.partialorder %v725_v16, 0.5  ;;  %s933_s20 = sshll.u32 %s1474_s19, 4  ;;  %s934_s20 = int_to_ptr.vmem [resolvable:$true] %s933_s20 }
 0x2d6   :  { %s1446_s28 = scalar_lea.vmem %s934_s20, 128  ;;  %p1451_p1 = scmp.lt.s32.totalorder %s934_s20, %s934_s20 }
 0x2d7   :  { %p1447_p0 = scmp.ne.s32.totalorder %s934_s20, %s1446_s28  ;;  %p1452_p2 = scmp.lt.s32.totalorder %s1446_s28, %s1446_s28 }
 0x2d8   :  { %1406 = vmatpush3.bf16.msra.mxu0 %v1405_v43 }
 0x2d9   :  { %p1453_p3 = por %p1452_p2, %p1451_p1 }
 0x2db   :  { %p1454_p4 = pnand %p1453_p3, %p1447_p0 }
 0x38e   :  { %v517_v18 = vpop.f32.mrb[4].mxu0 }
 0x38f   :  { %v518_v19 = vadd.f32 %v949_v17, %v517_v18  ;;  %v1192_v20 = vpop.f32.mrb[5].mxu0  ;;  %v731_v17 = vshrl.u32 %v730_v12, 7 }
 0x390   :  { %v1473_v20 = vmov 0  }
 0x391   :  { %v521_v21 = vmax.f32 %v518_v19, 0.0  ;;  %v732_v19 = vsub.s32 0, %v731_v17  ;;  %v736_v23 = vsel %vm727_vm4, 1, %v1473_v20 }
 0x393   :  { %1210 = vmatmul.mubr.msk.f32.vlgmr.msra.gmra.mrb[4].mxu1 %vm364_vm1, %v521_v21  ;;  %v729_v21 = vsel %vm728_vm3, 1, %v1473_v20 }
 0x394   :  { %1248 = vmatpush3.msra.mxu1 %v744_v22  ;;  %1249 = vmatprep.mubr.msk.f32.mxu1 %vm1471_vm0, %v1472_v11  ;;  %v733_v26 = vrot.slane %v729_v21, %v732_v19 }
 0x395   :  { %1407 = vmatprep.subr.bf16.mxu1 %v1470_v3 }
 0x396   :  { %vm734_vm6 = vcmp.eq.s32.totalorder %v733_v26, 1 }
 0x397   :  { %1250 = vmatmul.mubr.msk.f32.vlgmr.msra.gmra.mrb[6].mxu1 %vm447_vm2, %v438_v54 }
 0x398   :  { %1409 = vmatpush3.bf16.msra.mxu1 %v1408_v25  ;;  %1284 = vmatprep.mubr.msk.f32.mxu1 %vm1471_vm0, %v1472_v11  ;;  %v830_v11 = vld [vmem:[%s2024_s17 + $0x38] sm:$0xff] }
 0x399   :  { %1410 = vmatprep.subr.bf16.mxu1 %v1470_v3  ;;  %v1417_v33 = vpack.c.bf16 %v830_v11, %v829_v32 }
 0x39c   :  { %1412 = vmatpush3.bf16.msra.mxu1 %v1411_v28  ;;  %v740_v28 = vrot.slane %v736_v23, %v732_v19 }
 0x39d   :  { %1413 = vmatprep.subr.bf16.mxu1 %v1470_v3 }
 0x39e   :  { %vm741_vm7 = vcmp.eq.s32.totalorder %v740_v28, 1 }
 0x3a0   :  { %1415 = vmatpush3.bf16.msra.mxu1 %v1414_v31 }
 0x3a1   :  { %1416 = vmatprep.subr.bf16.mxu1 %v1470_v3 }
 0x3a4   :  { %1418 = vmatpush3.bf16.msra.mxu1 %v1417_v33 }
 0x3a5   :  { %1419 = vmatprep.subr.bf16.mxu1 %v1470_v3 }
 0x3a8   :  { %1421 = vmatpush3.bf16.msra.mxu1 %v1420_v36 }
 0x3a9   :  { %1422 = vmatprep.subr.bf16.mxu1 %v1470_v3 }
 0x3ac   :  { %1424 = vmatpush3.bf16.msra.mxu1 %v1423_v39 }
 0x3ad   :  { %1425 = vmatprep.subr.bf16.mxu1 %v1470_v3 }
 0x3b0   :  { %1427 = vmatpush3.bf16.msra.mxu1 %v1426_v45 }
 0x3b1   :  { %1428 = vmatprep.subr.bf16.mxu1 %v1470_v3  ;;  %v953_v3 = vld [vmem:[%s2021_s14] ss:$0 sm:$0xff] }
 0x3b4   :  { %1430 = vmatpush3.bf16.msra.mxu1 %v1429_v48 }
 0x466   :  { %v606_v50 = vpop.f32.mrb[4].mxu1 }
 0x467   :  { %v607_v51 = vadd.f32 %v951_v49, %v606_v50  ;;  %v1211_v52 = vpop.f32.mrb[5].mxu1 }
 0x469   :  { %v610_v54 = vmax.f32 %v607_v51, 0.0 }
 0x46a   :  { %v818_v55 = vpop.f32.mrb[6].mxu1 }
 0x46b   :  { %v819_v56 = vadd.f32 %v954_v53, %v818_v55  ;;  %1245 = vmatmul.mubr.f32.vlgmr.msra.gmra.mrb[6].mxu0 %v610_v54  ;;  %v1251_v57 = vpop.f32.mrb[7].mxu1 }
 0x46d   :  { %v822_v58 = vmax.f32 %v819_v56, 0.0 }
 0x46f   :  { %1285 = vmatmul.mubr.f32.vlgmr.msra.gmra.mrb[8].mxu1 %v822_v58 }
 0x53e   :  { %v700_v59 = vpop.f32.mrb[6].mxu0 }
 0x53f   :  { %v701_v60 = vadd.f32 %v953_v3, %v700_v59  ;;  %v1246_v61 = vpop.f32.mrb[7].mxu0 }
 0x541   :  { %v704_v63 = vand.u32 2147483647, %v701_v60  ;;  %v714_v31 = vmax.f32 %v701_v60, 0.0  ;;  %vm711_vm9 = vcmp.ge.f32.partialorder %v701_v60, 0.0 }
 0x542   :  { %v912_v0 = vpop.f32.mrb[8].mxu1 }
 0x543   :  { %v705_v1 = vsub.f32 0.0, %v704_v63  ;;  %v913_v2 = vadd.f32 %v956_v62, %v912_v0  ;;  %v1286_v4 = vpop.f32.mrb[9].mxu1 }
 0x545   :  { %v706_v5 = vmul.f32 1.442695, %v705_v1  ;;  %v916_v6 = vand.u32 2147483647, %v913_v2  ;;  %vm923_vm8 = vcmp.ge.f32.partialorder %v913_v2, 0.0 }
 0x547   :  { %1436 = vpow2.f32 %v706_v5  ;;  %v917_v7 = vsub.f32 0.0, %v916_v6 }
 0x549   :  { %v918_v8 = vmul.f32 1.442695, %v917_v7 }
 0x54b   :  { %1438 = vpow2.f32 %v918_v8 }
 0x551   :  { %v1437_v9 = vpop.eup %1436 }
 0x552   :  { %v708_v10 = vadd.f32 1.0, %v1437_v9  ;;  %v718_v18 = vmul.f32 -0.5, %v1437_v9  ;;  %v721_v24 = vand.u32 2147483647, %v1437_v9 }
 0x554   :  { %1440 = vrcp.f32 %v708_v10  ;;  %v719_v22 = vadd.f32 1.0, %v718_v18  ;;  %vm722_vm5 = vcmp.lt.f32.partialorder %v721_v24, 0.0004427343 }
 0x555   :  { %v1439_v13 = vpop.eup %1438  ;;  %1442 = vlog2.f32 %v708_v10 }
 0x556   :  { %v920_v15 = vadd.f32 1.0, %v1439_v13  ;;  %v720_v30 = vmul.f32 %v1437_v9, %v719_v22 }
 0x558   :  { %1444 = vrcp.f32 %v920_v15 }
 0x55e   :  { %v1441_v25 = vpop.eup %1440 }
 0x55f   :  { %v1443_v27 = vpop.eup %1442  ;;  %v712_v32 = vmul.f32 %v1441_v25, %v1437_v9 }
 0x560   :  { %v717_v29 = vmul.f32 0.6931472, %v1443_v27 }
 0x561   :  { %v713_v37 = vsel %vm711_vm9, %v1441_v25, %v712_v32 }
 0x562   :  { %v1445_v11 = vpop.eup %1444  ;;  %v723_v33 = vsel %vm722_vm5, %v720_v30, %v717_v29 }
 0x563   :  { %v924_v34 = vmul.f32 %v1445_v11, %v1439_v13  ;;  %v724_v35 = vadd.f32 %v723_v33, %v714_v31 }
 0x565   :  { %v925_v36 = vsel %vm923_vm8, %v1445_v11, %v924_v34  ;;  %v735_v38 = vsel %vm734_vm6, %v724_v35, %v701_v60 }
 0x566   :  { %926 = vst [vmem:[%s2029_s22] sm:$0xff] %v925_v36  ;;  %v742_v39 = vsel %vm741_vm7, %v713_v37, %v735_v38 }
 0x567   :  { %743 = vst [vmem:[#allocation2] sm:$0xff] %v742_v39 }
 0x568   :  { %1457 = shalt.err (!%p1454_p4)
}
 0x569   :  { %s1458_s7 = scalar_lea.hbm %s2028_s21, 128 }
 0x56a   :  { %p1459_p5 = scmp.ne.s32.totalorder %s2028_s21, %s1458_s7  ;;  %p1462_p6 = scmp.lt.u32.totalorder %s1458_s7, %s2028_s21 }
 0x56c   :  { %p1464_p7 = pnand %p1462_p6, %p1459_p5 }
 0x56e   :  { %1467 = shalt.err (!%p1464_p7)
}
 0x56f   :  { %936 = dma.vmem_to_hbm [thread:$0]  %s934_s20, 128, %s2028_s21, [#allocation3]  }
 0x570   :  { %1468 = dma.done.wait [#allocation3], 128  }
 0x571   :  { %1469 = vsyncadd [#allocation3], 4294967168 }
 0x572   :  { %944 = vsyncpa [#allocation3], 1 }

</bundles_post_ra>
